<compile_context>
chip_gen: v5e
topology: v5e:2x2
jax: 0.10.0
libtpu: 0.0.40
codegen_flags: <defaults>
</compile_context>

<pallas_src>
import functools

import jax
import jax.numpy as jnp
from jax.experimental import pallas as pl
from jax.experimental.pallas import tpu as pltpu


def _deepseek_mlp_kernel(x_ref, wgu_ref, wd_ref, o_ref, acc_ref, h_ref, *, cs, nc):
    # x_ref:   (tm, H)       token tile
    # wgu_ref: (H, 2*ti)     nc chunks of [gate_cs | up_cs] for this k
    # wd_ref:  (ti, H)       down-projection slab for this k
    # o_ref:   (tm, H)       output tile (written on last k only)
    # acc_ref: (tm, H) f32   accumulator scratch (resident across k)
    # h_ref:   (tm, ti)      narrowed SiLU*up activations for this k
    k = pl.program_id(1)

    @pl.when(k == 0)
    def _():
        acc_ref[...] = jnp.zeros_like(acc_ref)

    x = x_ref[...]
    # Chunked first projection + SiluAndMul epilogue: each chunk is one wide
    # MXU matmul; its f32 output is narrowed immediately so only a (tm, 2*cs)
    # f32 value is live at a time.
    for c in range(nc):
        gu = jnp.dot(x, wgu_ref[:, 2 * cs * c:2 * cs * (c + 1)],
                     preferred_element_type=jnp.float32)        # (tm, 2*cs)
        gate = gu[:, :cs]
        up = gu[:, cs:]
        h_ref[:, cs * c:cs * (c + 1)] = (
            (gate * jax.nn.sigmoid(gate)) * up).astype(h_ref.dtype)

    # Single down-projection per k step -> one full-accumulator RMW per step.
    acc_ref[...] += jnp.dot(h_ref[...], wd_ref[...],
                            preferred_element_type=jnp.float32)

    @pl.when(k == pl.num_programs(1) - 1)
    def _():
        o_ref[...] = acc_ref[...].astype(o_ref.dtype)


def _device_kind():
    try:
        return jax.devices()[0].device_kind.lower()
    except Exception:  # pragma: no cover
        return ""


def _vmem_capacity_bytes(kind):
    try:
        return int(pltpu.get_tpu_info().vmem_capacity_bytes)
    except Exception:
        # v7x has 64 MiB VMEM per TensorCore; v5e/v6e have 128 MiB.
        return (64 << 20) if ("7" in kind) else (128 << 20)


@functools.partial(jax.jit,
                   static_argnames=("token_tile", "inter_tile", "act_chunk"))
def deepseek_mlp(x, w_gate, w_up, w_down, *,
                 token_tile=None, inter_tile=None, act_chunk=None):
    """Fused MLP: out = (silu(x @ w_gate) * (x @ w_up)) @ w_down."""
    T, H = x.shape
    H2, I = w_gate.shape
    assert H2 == H and w_up.shape == (H, I) and w_down.shape == (I, H)

    bpe = jnp.dtype(x.dtype).itemsize
    sub = 16 if jnp.dtype(x.dtype) == jnp.dtype(jnp.bfloat16) else 8

    kind = _device_kind()
    is_v7 = "7" in kind
    is_v6 = "v6" in kind
    is_v5e = ("v5 lite" in kind) or ("v5e" in kind) or ("v5litepod" in kind)
    vmem_cap = _vmem_capacity_bytes(kind)
    budget = int(0.85 * vmem_cap)

    auto_tm = token_tile is None
    auto_ti = inter_tile is None
    if auto_tm:
        # Weight-stream intensity ~ tm FLOP per weight byte: v6e's HBM ridge
        # (~650 FLOP/B) wants tm=512; v7x/v5e keep 256 (v7x is VMEM-limited).
        token_tile = 512 if is_v6 else 256
    if auto_ti:
        # Larger ti -> fewer k steps -> fewer (tm,H) accumulator RMW passes.
        # v7x (64 MiB VMEM) must stay at 256; v5e benefits from 1024.
        inter_tile = 256 if is_v7 else (1024 if is_v5e else 512)

    def fit(v, limit, align):
        v = int(max(1, min(v, limit)))
        if v < limit and v % align:
            v = max(align, (v // align) * align)
        return min(v, limit)

    tm = fit(token_tile, T, sub)   # sublane-aligned unless tm == T
    ti = fit(inter_tile, I, 64)    # keeps the 2*ti lane dim 128-aligned

    def vmem_need(tm_, ti_):
        return (2 * bpe * (tm_ * H + H * 2 * ti_ + ti_ * H + tm_ * H)  # dbl-buffered streams
                + 4 * tm_ * H                                          # f32 accumulator
                + bpe * tm_ * ti_)                                     # h scratch

    # Auto tiles must fit the *device's* VMEM (v7x: 64 MiB, v5e/v6e: 128 MiB).
    if auto_ti:
        while vmem_need(tm, ti) > budget and ti > 256:
            ti = max(256, ti // 2)
    if auto_tm:
        while vmem_need(tm, ti) > budget and tm > 256:
            tm = max(256, tm // 2)

    # v7x shards the "parallel" token axis across 2 TensorCores: make sure
    # there are at least 2 token tiles when the shape allows it.
    if auto_tm and is_v7 and pl.cdiv(T, tm) < 2 and T >= 2 * sub:
        half = -(-T // 2)
        tm = min(T, ((half + sub - 1) // sub) * sub)

    kt = pl.cdiv(I, ti)
    i_pad = kt * ti

    # Epilogue chunk width (sub-tiles of the intermediate dim).
    if act_chunk is not None:
        cs = int(min(act_chunk, ti))
        if ti % cs:
            cs = ti
    else:
        cs = ti
        for cand in (512, 256):
            if ti > cand and ti % cand == 0:
                cs = cand
                break
    nc = ti // cs

    # Zero-pad I to a multiple of ti. Padding is numerically inert:
    # gate==0 => silu(0)*up == 0, and the padded down-proj rows are zero.
    if i_pad != I:
        w_gate = jnp.pad(w_gate, ((0, 0), (0, i_pad - I)))
        w_up = jnp.pad(w_up, ((0, 0), (0, i_pad - I)))
        w_down = jnp.pad(w_down, ((0, i_pad - I), (0, 0)))

    # Pack gate/up so every cs-wide chunk holds [gate_chunk | up_chunk]
    # adjacently: each chunk is a single wide MXU matmul in the kernel.
    # TODO(synk): pre-pack the weights once at load time instead of per call.
    w_gu = jnp.concatenate(
        [w_gate.reshape(H, kt, nc, cs), w_up.reshape(H, kt, nc, cs)], axis=-1
    ).reshape(H, kt * 2 * ti)

    grid = (pl.cdiv(T, tm), kt)

    need = vmem_need(tm, ti)
    # Cap the scoped VMEM request at 85% of the device's actual capacity
    # (v7x has only 64 MiB per TC) instead of a fixed ceiling.
    vmem_limit = int(min(max(int(1.15 * need) + (2 << 20), 32 << 20),
                         int(0.85 * vmem_cap)))

    # Weights are re-streamed once per token tile (not once total).
    n_token_tiles = pl.cdiv(T, tm)
    cost = pl.CostEstimate(
        flops=6 * T * H * I,
        transcendentals=T * I,
        bytes_accessed=bpe * (2 * T * H + 3 * H * i_pad * n_token_tiles),
    )

    kernel = functools.partial(_deepseek_mlp_kernel, cs=cs, nc=nc)

    return pl.pallas_call(
        kernel,
        out_shape=jax.ShapeDtypeStruct((T, H), x.dtype),
        grid_spec=pltpu.PrefetchScalarGridSpec(
            num_scalar_prefetch=0,
            grid=grid,
            in_specs=[
                pl.BlockSpec((tm, H), lambda i, k: (i, 0)),       # x token tile
                pl.BlockSpec((H, 2 * ti), lambda i, k: (0, k)),   # gate|up slab
                pl.BlockSpec((ti, H), lambda i, k: (k, 0)),       # down slab
            ],
            out_specs=pl.BlockSpec((tm, H), lambda i, k: (i, 0)),
            scratch_shapes=[pltpu.VMEM((tm, H), jnp.float32),     # f32 accumulator
                            pltpu.VMEM((tm, ti), x.dtype)],       # narrowed h tile
        ),
        compiler_params=pltpu.CompilerParams(
            dimension_semantics=("parallel", "arbitrary"),
            vmem_limit_bytes=vmem_limit,
        ),
        cost_estimate=cost,
    )(x, w_gu, w_down)


def _reference(x, w_gate, w_up, w_down):
    xf = x.astype(jnp.float32)
    gate = xf @ w_gate.astype(jnp.float32)
    up = xf @ w_up.astype(jnp.float32)
    h = (gate * jax.nn.sigmoid(gate)) * up
    return (h @ w_down.astype(jnp.float32)).astype(jnp.float32)


if __name__ == "__main__":
    # Small shapes consistent with the module: tokens=16, hidden=32, inter=128.
    T, H, I = 16, 32, 128
    key = jax.random.PRNGKey(0)
    kx, kg, ku, kd = jax.random.split(key, 4)

    x = jax.random.normal(kx, (T, H), dtype=jnp.float32)
    # Deterministic synthetic parameters (not loaded from a checkpoint).
    w_gate = jax.random.normal(kg, (H, I), dtype=jnp.float32) * 0.05
    w_up = jax.random.normal(ku, (H, I), dtype=jnp.float32) * 0.05
    w_down = jax.random.normal(kd, (I, H), dtype=jnp.float32) * 0.05

    ref = _reference(x, w_gate, w_up, w_down)

    # (1) Tiled reduction over I: (2, 2) grid exercises both the parallel
    #     token axis and the k-accumulation.
    out = deepseek_mlp(x, w_gate, w_up, w_down, token_tile=8, inter_tile=64)
    out = jax.block_until_ready(out)
    assert out.shape == (T, H)
    assert jnp.allclose(out.astype(jnp.float32), ref, atol=1e-4, rtol=1e-4), \
        "f32 mismatch vs reference"

    # (2) Chunked SiLU*up epilogue (nc=2 chunks per k step).
    out_c = deepseek_mlp(x, w_gate, w_up, w_down,
                         token_tile=8, inter_tile=64, act_chunk=32)
    out_c = jax.block_until_ready(out_c)
    assert jnp.allclose(out_c.astype(jnp.float32), ref, atol=1e-4, rtol=1e-4), \
        "chunked-epilogue mismatch vs reference"

    # (3) Auto (generation-tuned) tile selection path.
    out_auto = deepseek_mlp(x, w_gate, w_up, w_down)
    out_auto = jax.block_until_ready(out_auto)
    assert jnp.allclose(out_auto.astype(jnp.float32), ref, atol=1e-4, rtol=1e-4), \
        "auto-tile mismatch vs reference"

    # (4) bf16 path (how the kernel is meant to run for real Deepseek shapes).
    out_bf16 = deepseek_mlp(
        x.astype(jnp.bfloat16), w_gate.astype(jnp.bfloat16),
        w_up.astype(jnp.bfloat16), w_down.astype(jnp.bfloat16),
        token_tile=8, inter_tile=64)
    out_bf16 = jax.block_until_ready(out_bf16)
    assert out_bf16.shape == (T, H)
    assert float(jnp.max(jnp.abs(out_bf16.astype(jnp.float32) - ref))) < 5e-2, \
        "bf16 mismatch vs reference"

    print("KERNEL_OK")
</pallas_src>

<mosaic_0001>
module attributes {stable_mosaic.version = 11 : i64} {
  func.func @_deepseek_mlp_kernel(%arg0: i32, %arg1: i32, %arg2: memref<8x32xf32, #tpu.memory_space<vmem>>, %arg3: memref<32x128xf32, #tpu.memory_space<vmem>>, %arg4: memref<64x32xf32, #tpu.memory_space<vmem>>, %arg5: memref<8x32xf32, #tpu.memory_space<vmem>>, %arg6: memref<8x32xf32, #tpu.memory_space<vmem>>, %arg7: memref<8x64xf32, #tpu.memory_space<vmem>>) attributes {dimension_semantics = [#tpu.dimension_semantics<parallel>, #tpu.dimension_semantics<arbitrary>], iteration_bounds = array<i64: 2, 2>, scalar_prefetch = 0 : i64, scratch_operands = 2 : i64, tpu.core_type = #tpu.core_type<tc>, window_params = [{transform_indices = @transform_0, window_bounds = array<i64: 8, 32>}, {transform_indices = @transform_1, window_bounds = array<i64: 32, 128>}, {transform_indices = @transform_2, window_bounds = array<i64: 64, 32>}, {transform_indices = @transform_3, window_bounds = array<i64: 8, 32>}]} {
    %c0_i32 = arith.constant 0 : i32
    %0 = arith.cmpi eq, %arg1, %c0_i32 : i32
    %1 = arith.extui %0 : i1 to i32
    %c0_i32_0 = arith.constant 0 : i32
    %2 = arith.cmpi ne, %1, %c0_i32_0 : i32
    scf.if %2 {
      %cst_17 = arith.constant 0.000000e+00 : f32
      %25 = vector.broadcast %cst_17 : f32 to vector<8x32xf32>
      %c0_18 = arith.constant 0 : index
      %c0_19 = arith.constant 0 : index
      %26 = vector.load %arg6[%c0_18, %c0_19] : memref<8x32xf32, #tpu.memory_space<vmem>>, vector<8x32xf32>
      tpu.vector_store %arg6[%c0_18, %c0_19], %25 {strides = array<i32>} : memref<8x32xf32, #tpu.memory_space<vmem>>, vector<8x32xf32>,
    } else {
    }
    %c0 = arith.constant 0 : index
    %c0_1 = arith.constant 0 : index
    %3 = vector.load %arg2[%c0, %c0_1] : memref<8x32xf32, #tpu.memory_space<vmem>>, vector<8x32xf32>
    %c0_2 = arith.constant 0 : index
    %c0_3 = arith.constant 0 : index
    %4 = vector.load %arg3[%c0_2, %c0_3] : memref<32x128xf32, #tpu.memory_space<vmem>>, vector<32x128xf32>
    %cst = arith.constant dense<0.000000e+00> : vector<8x128xf32>
    %5 = tpu.matmul %3, %4, %cst {dimension_numbers = #tpu.dot_dimension_numbers<[1], [0], [0], [1], [0, 0, 1, 1], [], []>} : vector<8x32xf32>, vector<32x128xf32>, vector<8x128xf32> -> vector<8x128xf32>
    %6 = vector.extract_strided_slice %5 {offsets = [0, 0], sizes = [8, 64], strides = [1, 1]} : vector<8x128xf32> to vector<8x64xf32>
    %7 = vector.extract_strided_slice %5 {offsets = [0, 64], sizes = [8, 64], strides = [1, 1]} : vector<8x128xf32> to vector<8x64xf32>
    %8 = arith.negf %6 : vector<8x64xf32>
    %9 = math.exp %8 : vector<8x64xf32>
    %cst_4 = arith.constant 1.000000e+00 : f32
    %10 = vector.broadcast %cst_4 : f32 to vector<8x64xf32>
    %11 = arith.addf %10, %9 : vector<8x64xf32>
    %12 = arith.divf %10, %11 : vector<8x64xf32>
    %13 = arith.mulf %6, %12 : vector<8x64xf32>
    %14 = arith.mulf %13, %7 : vector<8x64xf32>
    %c0_5 = arith.constant 0 : index
    %c0_6 = arith.constant 0 : index
    %15 = vector.load %arg7[%c0_5, %c0_6] : memref<8x64xf32, #tpu.memory_space<vmem>>, vector<8x64xf32>
    tpu.vector_store %arg7[%c0_5, %c0_6], %14 {strides = array<i32>} : memref<8x64xf32, #tpu.memory_space<vmem>>, vector<8x64xf32>,
    %c0_7 = arith.constant 0 : index
    %c0_8 = arith.constant 0 : index
    %16 = vector.load %arg6[%c0_7, %c0_8] : memref<8x32xf32, #tpu.memory_space<vmem>>, vector<8x32xf32>
    %c0_9 = arith.constant 0 : index
    %c0_10 = arith.constant 0 : index
    %17 = vector.load %arg7[%c0_9, %c0_10] : memref<8x64xf32, #tpu.memory_space<vmem>>, vector<8x64xf32>
    %c0_11 = arith.constant 0 : index
    %c0_12 = arith.constant 0 : index
    %18 = vector.load %arg4[%c0_11, %c0_12] : memref<64x32xf32, #tpu.memory_space<vmem>>, vector<64x32xf32>
    %cst_13 = arith.constant dense<0.000000e+00> : vector<8x32xf32>
    %19 = tpu.matmul %17, %18, %cst_13 {dimension_numbers = #tpu.dot_dimension_numbers<[1], [0], [0], [1], [0, 0, 1, 1], [], []>} : vector<8x64xf32>, vector<64x32xf32>, vector<8x32xf32> -> vector<8x32xf32>
    %20 = arith.addf %16, %19 : vector<8x32xf32>
    %c0_14 = arith.constant 0 : index
    %c0_15 = arith.constant 0 : index
    %21 = vector.load %arg6[%c0_14, %c0_15] : memref<8x32xf32, #tpu.memory_space<vmem>>, vector<8x32xf32>
    tpu.vector_store %arg6[%c0_14, %c0_15], %20 {strides = array<i32>} : memref<8x32xf32, #tpu.memory_space<vmem>>, vector<8x32xf32>,
    %c1_i32 = arith.constant 1 : i32
    %22 = arith.cmpi eq, %arg1, %c1_i32 : i32
    %23 = arith.extui %22 : i1 to i32
    %c0_i32_16 = arith.constant 0 : i32
    %24 = arith.cmpi ne, %23, %c0_i32_16 : i32
    scf.if %24 {
      %c0_17 = arith.constant 0 : index
      %c0_18 = arith.constant 0 : index
      %25 = vector.load %arg6[%c0_17, %c0_18] : memref<8x32xf32, #tpu.memory_space<vmem>>, vector<8x32xf32>
      %c0_19 = arith.constant 0 : index
      %c0_20 = arith.constant 0 : index
      %26 = vector.load %arg5[%c0_19, %c0_20] : memref<8x32xf32, #tpu.memory_space<vmem>>, vector<8x32xf32>
      tpu.vector_store %arg5[%c0_19, %c0_20], %25 {strides = array<i32>} : memref<8x32xf32, #tpu.memory_space<vmem>>, vector<8x32xf32>,
    } else {
    }
    return
  }
  func.func @transform_0(%arg0: i32, %arg1: i32) -> (i32, i32) {
    %c0_i32 = arith.constant 0 : i32
    %c0_i32_0 = arith.constant 0 : i32
    return %arg0, %c0_i32 : i32, i32
  }
  func.func @transform_1(%arg0: i32, %arg1: i32) -> (i32, i32) {
    %c0_i32 = arith.constant 0 : i32
    %c0_i32_0 = arith.constant 0 : i32
    return %c0_i32, %arg1 : i32, i32
  }
  func.func @transform_2(%arg0: i32, %arg1: i32) -> (i32, i32) {
    %c0_i32 = arith.constant 0 : i32
    %c0_i32_0 = arith.constant 0 : i32
    return %arg1, %c0_i32 : i32, i32
  }
  func.func @transform_3(%arg0: i32, %arg1: i32) -> (i32, i32) {
    %c0_i32 = arith.constant 0 : i32
    %c0_i32_0 = arith.constant 0 : i32
    return %arg0, %c0_i32 : i32, i32
  }
}

</mosaic_0001>

<bundles_post_ra>
// kernel: deepseek_mlp.1
= control target key start
LH: loop header
LB: loop body
LE: loop exit
PB: predicated region body
PF: predicated region fallthrough
CT: control target
= control target key end

     0   :  { %s919_s0 = inlined_call_operand.vmem [shape: f32[16,32], index: 0, kind: input, shape index: {}]   ;;  %s920_s1 = inlined_call_operand.vmem [shape: f32[32,256], index: 1, kind: input, shape index: {}]   ;;  %s921_s2 = inlined_call_operand.vmem [shape: f32[128,32], index: 2, kind: input, shape index: {}]   ;;  %s922_s3 = inlined_call_operand.hbm [shape: f32[16,32], index: 3, kind: output, shape index: {}]  }
   0x1   :  { %925 = sst [smem:[#allocation9_spill]] %s920_s1 }
   0x2   :  { %8 = vsyncpa [#allocation6], 0 }
   0x3   :  { %10 = vsyncpa [#allocation6 + $0x1], 0  ;;  %s734_s12 = smov 0   ;;  %s736_s13 = smov 0  }
   0x4   :  { %s738_s14 = smov 0   ;;  %s740_s15 = smov 0  }
   0x5   :  { %s742_s16 = smov 0   ;;  %s744_s17 = smov 0  }
   0x6   :  { %s746_s18 = smov 0   ;;  %s748_s19 = smov 0  }
   0x7   :  { %s750_s20 = smov 0   ;;  %s752_s21 = smov 0  }
   0x8 LB: > { %s486_s22 = sadd.s32 4294967295, %s710_s21   ;;  %s487_s23 = sadd.s32 4294967294, %s710_s21   ;;  %s710_s21 = sphi %s752_s21, %s16_s21   ;;  %s706_s20 = sphi %s750_s20, %s941_s20   ;;  %s702_s19 = sphi %s748_s19, %s940_s19   ;;  %s698_s18 = sphi %s746_s18, %s939_s18   ;;  %s694_s17 = sphi %s744_s17, %s938_s17   ;;  %s690_s16 = sphi %s742_s16, %s937_s16   ;;  %s686_s15 = sphi %s740_s15, %s936_s15   ;;  %s682_s14 = sphi %s738_s14, %s935_s14   ;;  %s678_s13 = sphi %s736_s13, %s934_s13   ;;  %s674_s12 = sphi %s734_s12, %s933_s12  }
   0x9   : > { %s25_s24 = sadd.s32 1, %s702_s19  ;;  %s28_s25 = sadd.s32 1, %s706_s20 }
   0xa   : > { %p26_p0 = scmp.ge.s32.totalorder %s25_s24, 2  ;;  %s61_s26 = sadd.s32 1, %s690_s16 }
   0xb   : > { %p68_p1 = scmp.ne.s32.totalorder %s690_s16, %s686_s15  ;;  %p69_p2 = scmp.eq.s32.totalorder %s710_s21, 0 }
   0xc   : > { %s943_s24 = smov (%p26_p0, %s25_s24), 0  ;;  %s945_s25 = smov (!%p26_p0, %s28_s25), %s706_s20 }
   0xd   : > { %s58_s27 = ssub.s32 %s702_s19, %s943_s24  ;;  %p797_p3 = por %p69_p2, %p68_p1 }
   0xe   : > { %p30_p4 = scmp.ge.s32.totalorder %s945_s25, 2  ;;  %p59_p5 = scmp.eq.s32.totalorder %s58_s27, 0 }
   0xf   : > { %s113_s29 = sadd.s32 1, %s682_s14  ;;  %p123_p6 = scmp.ne.s32.totalorder %s682_s14, %s678_s13 }
  0x10   : > { %s947_s25 = smov (%p30_p4, %s945_s25), 0  ;;  %p124_p7 = scmp.eq.s32.totalorder %s486_s22, 3 }
  0x11   : > { %927 = sst [smem:[#allocation8_spill]] %s947_s25  ;;  %s110_s4 = ssub.s32 %s706_s20, %s947_s25 }
  0x12   : > { %s807_s30 = scalar_select %p59_p5, %s690_s16, %s61_s26  }
  0x13   : > { %p111_p8 = scmp.eq.s32.totalorder %s110_s4, 0  ;;  %p129_p9 = scmp.ne.s32.totalorder %s678_s13, %s674_s12 }
  0x14   : > { %p813_p10 = por %p124_p7, %p123_p6  ;;  %p130_p11 = scmp.eq.s32.totalorder %s487_s23, 3 }
  0x15   : > { %s818_s6 = scalar_select %p111_p8, %s682_s14, %s113_s29  }
  0x16   : > { %p820_p12 = por %p130_p11, %p129_p9  ;;  %p489_p13 = scmp.ge.s32.totalorder %s710_s21, 4 }
  0x18   : > { %146 = sbr.rel (%p489_p13) target bundleno = 43 (0x2b), region = 16 }
  0x1d   : > { %156 = sbr.rel (!%p797_p3) target bundleno = 43 (0x2b), region = 24  ;;  %s158_s8 = sand.u32 (%p797_p3), 1, %s690_s16  }
  0x1e   : > { %s491_s9 = sshll.u32 (%p797_p3), %s702_s19, 3  ;;  %s490_s10 = sshll.u32 (%p797_p3), %s158_s8, 5 }
  0x1f   : > { %s930_s1 = sld [smem:[#allocation9_spill]] (%p797_p3)  ;;  %s160_s26 = scalar_lea.vmem (%p797_p3), [#allocation4], %s490_s10 }
  0x25   : > { %s162_s23 = scalar_lea.vmem %s930_s1, %s491_s9 }
  0x26   : > { %v197_v0 = vld [vmem:[%s162_s23] sm:$0xff]  ;;  %v199_v1 = vld [vmem:[%s162_s23 + $0x10] sm:$0xff] }
  0x27   : > { %v201_v2 = vld [vmem:[%s162_s23 + $0x20] sm:$0xff]  ;;  %198 = vst [vmem:[%s160_s26] sm:$0xff] %v197_v0  ;;  %v203_v3 = vld [vmem:[%s162_s23 + $0x30] sm:$0xff] }
  0x28   : > { %200 = vst [vmem:[%s160_s26 + $0x8] sm:$0xff] %v199_v1 }
  0x29   : > { %202 = vst [vmem:[%s160_s26 + $0x10] sm:$0xff] %v201_v2 }
  0x2a   : > { %204 = vst [vmem:[%s160_s26 + $0x18] sm:$0xff] %v203_v3 }
  0x2b PF: > { %p492_p0 = scmp.ge.s32.totalorder %s710_s21, 1  ;;  %p218_p1 = scmp.lt.s32.totalorder %s710_s21, 5 }
  0x2d   : > { %p219_p2 = pnand %p492_p0, %p218_p1 }
  0x2e   : > { %s225_s27 = sand.u32 (!%p219_p2), 1, %s686_s15   ;;  %s924_s28 = sand.u32 (!%p219_p2), 1, %s678_s13  }
  0x2f   : > { %222 = sbr.rel (%p219_p2) target bundleno = 471 (0x1d7), region = 66  ;;  %s493_s29 = sshll.u32 (!%p219_p2), %s225_s27, 5 }
  0x30   : > { %s838_s4 = sshll.u32 (!%p219_p2), %s924_s28, 3  ;;  %p257_p3 = scmp.lt.s32.totalorder (!%p219_p2), %s698_s18, 1 }
  0x31   : > { %s496_s8 = sshll.u32 (!%p219_p2), %s694_s17, 3  ;;  %s227_s27 = scalar_lea.vmem (!%p219_p2), [#allocation4], %s493_s29 }
  0x32   : > { %p262_p4 = scmp.lt.s32.totalorder (!%p219_p2), %s496_s8, 15  ;;  %s256_s28 = scalar_lea.vmem (!%p219_p2), [#allocation5], %s838_s4 }
  0x33   : > { %p498_p5 = scmp.ne.s32.totalorder (!%p219_p2), %s694_s17, 0 }
  0x34   : > { %s258_s9 = scalar_select %p257_p3, %s698_s18, 1 }
  0x35   : > { %s949_s8 = smov (!%p262_p4, %s496_s8), 15  ;;  %270 = sbr.rel (%p498_p5) target bundleno = 60 (0x3c), region = 74 }
  0x36   : > { %s495_s10 = sshll.u32 %s258_s9, 3  ;;  %s497_s26 = sshll.u32 %s949_s8, 3 }
  0x37   : > { %s260_s23 = scalar_lea.vmem %s919_s0, %s495_s10  ;;  %s849_s15 = scalar_lea.vmem %s921_s2, %s497_s26 }
  0x3a   : > { %vm271_vm0 = vcmask 261120   ;;  %v712_v4 = vmov 0.0  }
  0x3b   : > { %272 = vst.msk [vmem:[#allocation2] sm:$0xff] %vm271_vm0, %v712_v4 }
  0x3c PF: > { %v277_v5 = vld [vmem:[%s227_s27 + $0x18] sm:$0xff]  ;;  %v276_v6 = vld [vmem:[%s227_s27 + $0x10] sm:$0xff]  ;;  %v275_v7 = vld [vmem:[%s227_s27 + $0x8] sm:$0xff]  ;;  %vm278_vm1 = vcmask 261120   ;;  %s713_s1 = smov 64   ;;  %vm327_vm6 = vcmask 523264  }
  0x3d   : > { %294 = vmatpush.msra.mxu0 %v277_v5  ;;  %v274_v8 = vld [vmem:[%s227_s27] sm:$0xff]  ;;  %v273_v9 = vld [vmem:[%s260_s23] sm:$0xff]  ;;  %v338_v10 = vld [vmem:[%s849_s15 + $0x38] sm:$0xff]  ;;  %p502_p6 = scmp.ne.s32.totalorder %s694_s17, 1 }
  0x3e   : > { %v337_v11 = vld [vmem:[%s849_s15 + $0x30] sm:$0xff]  ;;  %350 = vmatpush.msra.mxu1 %v338_v10  ;;  %v336_v16 = vld [vmem:[%s849_s15 + $0x28] sm:$0xff]  ;;  %v335_v17 = vld [vmem:[%s849_s15 + $0x20] sm:$0xff] }
  0x3f   : > { %295 = vmatpush.msra.mxu0 %v276_v6  ;;  %v334_v18 = vld [vmem:[%s849_s15 + $0x18] sm:$0xff]  ;;  %v333_v19 = vld [vmem:[%s849_s15 + $0x10] sm:$0xff]  ;;  %v332_v20 = vld [vmem:[%s849_s15 + $0x8] sm:$0xff] }
  0x40   : > { %351 = vmatpush.msra.mxu1 %v337_v11  ;;  %v331_v22 = vld [vmem:[%s849_s15] sm:$0xff] }
  0x41   : > { %296 = vmatpush.msra.mxu0 %v275_v7 }
  0x42   : > { %352 = vmatpush.msra.mxu1 %v336_v16  ;;  %v329_v36 = vld [vmem:[#allocation2] sm:$0xff] }
  0x43   : > { %297 = vmatpush.msra.mxu0 %v274_v8 }
  0x44   : > { %499 = vmatmul.msk.f32.vlgmr.msra.gmra.mxu0 %vm278_vm1, %v273_v9  ;;  %353 = vmatpush.msra.mxu1 %v335_v17 }
  0x46   : > { %354 = vmatpush.msra.mxu1 %v334_v18 }
  0x48   : > { %355 = vmatpush.msra.mxu1 %v333_v19 }
  0x4a   : > { %356 = vmatpush.msra.mxu1 %v332_v20 }
  0x4c   : > { %357 = vmatpush.msra.mxu1 %v331_v22 }
  0xc1   : > { %v299_v12 = vpop.f32.mrf.mxu0 }
  0xc2   : > { %323 = vrot.lane.b32.xlu0 %v299_v12, %s713_s1  ;;  %v500_v13 = vmul.f32 -1.442695, %v299_v12 }
  0xc4   : > { %596 = vpow2.f32 %v500_v13 }
  0xca   : > { %v597_v14 = vpop.eup %596 }
  0xcb   : > { %v305_v15 = vadd.f32 1.0, %v597_v14 }
  0xcd   : > { %598 = vrcp.f32 %v305_v15  ;;  %v317_v27 = vand.u32 2147483648, %v305_v15  ;;  %vm311_vm3 = vweird.f32 %v305_v15  ;;  %v315_v28 = vand.u32 2147483647, %v305_v15 }
  0xcf   : > { %v318_v30 = vor.u32 1.1754944e-38, %v317_v27  ;;  %vm316_vm5 = vcmp.eq.f32.partialorder %v315_v28, 8.507059e+37 }
  0xd3   : > { %v599_v21 = vpop.eup %598 }
  0xd4   : > { %v307_v23 = vmul.f32 %v599_v21, %v305_v15  ;;  %vm312_vm2 = vweird.f32 %v599_v21 }
  0xd5   : > { %vm313_vm4 = vmor %vm311_vm3, %vm312_vm2 }
  0xd6   : > { %v308_v24 = vsub.f32 1.0, %v307_v23 }
  0xd8   : > { %v309_v25 = vmul.f32 %v599_v21, %v308_v24 }
  0xda   : > { %v310_v26 = vadd.f32 %v599_v21, %v309_v25 }
  0xdc   : > { %v314_v29 = vsel %vm313_vm4, %v599_v21, %v310_v26 }
  0xdd   : > { %v319_v31 = vsel %vm316_vm5, %v318_v30, %v314_v29 }
  0xde   : > { %v321_v32 = vmul.f32 %v319_v31, %v299_v12 }
 0x134   : > { %v324_v33 = vpop.permute.xlu0 %323 }
 0x135   : > { %v326_v34 = vmul.f32 %v324_v33, %v321_v32 }
 0x137   : > { %328 = vst.msk [vmem:[#allocation3] sm:$0xff] %vm327_vm6, %v326_v34 }
 0x13e   : > { %v330_v35 = vld [vmem:[#allocation3] sm:$0xff] }
 0x13f   : > { %501 = vmatmul.msk.f32.vlgmr.msra.gmra.mxu1 %vm327_vm6, %v330_v35 }
 0x1bb   : > { %367 = sbr.rel (%p502_p6) target bundleno = 456 (0x1c8), region = 78 }
 0x1bc   : > { %v359_v37 = vpop.f32.mrf.mxu1 }
 0x1bd   : > { %v362_v38 = vadd.f32 %v359_v37, %v329_v36 }
 0x1bf   : > { %363 = vst.msk [vmem:[#allocation2] sm:$0xff] %vm278_vm1, %v362_v38 }
 0x1c6   : > { %v368_v39 = vld [vmem:[#allocation2] sm:$0xff] }
 0x1c7   : > { %369 = vst.msk [vmem:[%s256_s28] sm:$0xff] %vm278_vm1, %v368_v39 }
 0x1c8 PF: > { %s504_s25 = sshll.u32 %s698_s18, 3  ;;  %s383_s10 = sshll.u32 %s256_s28, 4  ;;  %s384_s10 = int_to_ptr.vmem [resolvable:$true] %s383_s10 }
 0x1c9   : > { %s381_s9 = scalar_lea.hbm %s922_s3, %s504_s25  ;;  %s931_s11 = sand.u32 1, %s678_s13  }
 0x1ca   : > { %s385_s17 = sshll.u32 %s381_s9, 4  ;;  %s371_s22 = scalar_lea.sflag [#allocation6], %s931_s11  ;;  %s386_s17 = int_to_ptr.hbm [resolvable:$true] %s385_s17 }
 0x1cb   : > { %s614_s23 = sshra.s32 %s386_s17, 4  ;;  %s620_s27 = scalar_lea.hbm %s922_s3, 16  ;;  %s615_s23 = int_to_ptr.hbm [resolvable:$true] %s614_s23 }
 0x1cc   : > { %s616_s26 = scalar_lea.hbm %s615_s23, 8  ;;  %p621_p11 = scmp.lt.s32.totalorder %s615_s23, %s922_s3 }
 0x1cd   : > { %p617_p7 = scmp.ne.s32.totalorder %s615_s23, %s616_s26  ;;  %p622_p13 = scmp.lt.s32.totalorder %s620_s27, %s616_s26 }
 0x1cf   : > { %p618_p8 = pnand %p617_p7, %p813_p10  ;;  %p623_p0 = por %p622_p13, %p621_p11 }
 0x1d1   : > { %p619_p9 = pneg %p618_p8 }
 0x1d3   : > { %p624_p1 = pnand %p623_p0, %p619_p9 }
 0x1d5   : > { %627 = shalt.err (!%p624_p1)
}
 0x1d6   : > { %507 = dma.vmem_to_hbm [thread:$0]  (%p813_p10), %s384_s10, 128, %s386_s17, %s371_s22  }
 0x1d7 PF: > { %p513_p2 = scmp.ge.s32.totalorder %s710_s21, 2  ;;  %s397_s28 = sand.u32 1, %s674_s12  }
 0x1d8   : > { %s398_s4 = scalar_lea.sflag [#allocation6], %s397_s28 }
 0x1d9   : > { %p510_p3 = pnand %p513_p2, %p820_p12 }
 0x1db   : > { %p511_p4 = pneg %p510_p3 }
 0x1dd   : > { %669 = dma.done.wait (%p511_p4), %s398_s4, 128  }
 0x1de   : > { %671 = vsyncadd (%p511_p4), %s398_s4, 4294967168  ;;  %s16_s21 = sadd.s32 1, %s710_s21   ;;  %s932_s5 = sld [smem:[#allocation8_spill]] }
 0x1df   : > { %p13_p5 = scmp.ge.s32.totalorder %s16_s21, 6   ;;  %s933_s12 = smov %s678_s13 }
 0x1e0   : > { %s934_s13 = smov %s682_s14  ;;  %s935_s14 = smov %s818_s6 }
 0x1e1   : > { %s936_s15 = smov %s690_s16  ;;  %s937_s16 = smov %s807_s30 }
 0x1e2   : > { %s938_s17 = smov %s702_s19  ;;  %s939_s18 = smov %s706_s20 }
 0x1e3   : > { %s940_s19 = smov %s943_s24  ;;  %15 = sbr.rel (!%p13_p5) target bundleno = 8 (0x8), region = 124 }
 0x1e4   : > { %s941_s20 = smov %s932_s5 }
 0x1e8   :  { %404 = vsyncpa [#allocation6], 1 }
 0x1e9   :  { %406 = vsyncpa [#allocation6 + $0x1], 1 }

</bundles_post_ra>
